<compile_context>
chip_gen: v6e
topology: v6e:2x2x1
jax: 0.10.0
libtpu: 0.0.40
codegen_flags: <defaults>
</compile_context>

<pallas_src>
import math

import jax
import jax.numpy as jnp
from jax.experimental import pallas as pl
from jax.experimental.pallas import tpu as pltpu


# --------------------------------------------------------------------------- #
# Kernel body                                                                 #
# --------------------------------------------------------------------------- #
def _attn_tile_body(q_ref, k_ref, v_ref, cos_q_ref, sin_q_ref, mask_ref,
                    out_ref, probs_ref, *, head_dim, use_roll):
    """One (batch, head-group, q-tile) program.

    q_ref          : (1, HB, Tq,  D)   un-rotated queries
    k_ref          : (1, HB, D, Skv)   pre-rotated keys, pre-transposed (resident)
    v_ref          : (1, HB, Skv, D)   (resident across the q-tile axis)
    cos_q / sin_q  : (Tq, D) f32       (1/sqrt(D) and rotate sign folded in)
    mask_ref       : (1, 1|HB, Tq, Skv) additive mask, or None
    out_ref        : (1, HB, Tq, D)
    probs_ref      : (1, HB, Tq, Skv)
    """
    D = head_dim
    in_dtype = q_ref.dtype

    # ---- rotary on Q only (K was rotated once on the host) -----------------
    qf = q_ref[0].astype(jnp.float32)                         # (HB, Tq, D)
    if use_roll:
        # half-rotation via the XLU (free slot); sign already folded in `sin`.
        q_sw = pltpu.roll(qf, shift=D // 2, axis=-1)
    else:
        # small / non-128-aligned head_dim: plain lane-slice swap.
        q_sw = jnp.concatenate([qf[..., D // 2:], qf[..., :D // 2]], axis=-1)
    # cast back to the input dtype so the MXU runs at narrow-dtype rate.
    q_rot = (qf * cos_q_ref[...] + q_sw * sin_q_ref[...]).astype(in_dtype)

    # ---- scores: native MXU orientation, no k relayout ---------------------
    scores = jnp.einsum("hqd,hdk->hqk", q_rot, k_ref[0],
                        preferred_element_type=jnp.float32)   # (HB, Tq, Skv)

    if mask_ref is not None:
        # (1|HB, Tq, Skv) broadcasts over the head-group axis.
        scores = scores + mask_ref[0].astype(jnp.float32)

    # ---- numerically-stable softmax over the kv axis -----------------------
    # Normalization uses an EUP reciprocal + one Newton step on the (HB,Tq,1)
    # column instead of a full-width divide over the (HB,Tq,Skv) tile.
    row_max = jnp.max(scores, axis=-1, keepdims=True)
    exp_s = jnp.exp(scores - row_max)
    denom = jnp.sum(exp_s, axis=-1, keepdims=True)
    r = pl.reciprocal(denom, approx=True)
    r = r * (2.0 - denom * r)                  # NR refinement, O(HB*Tq) cost
    # single full-width cast; reused for the P@V operand AND the probs store.
    probs_cast = (exp_s * r).astype(in_dtype)

    # attention dropout has p = 0.0 -> identity.

    out = jnp.einsum("hqk,hkd->hqd", probs_cast, v_ref[0],
                     preferred_element_type=jnp.float32)      # (HB, Tq, D)
    out_ref[0] = out.astype(out_ref.dtype)
    probs_ref[0] = probs_cast


# --------------------------------------------------------------------------- #
# Host-side helpers                                                           #
# --------------------------------------------------------------------------- #
def _rope_freqs(seq_len, head_dim, base):
    inv_freq = 1.0 / (base ** (jnp.arange(0, head_dim, 2, dtype=jnp.float32)
                               / head_dim))
    pos = jnp.arange(seq_len, dtype=jnp.float32)
    return pos[:, None] * inv_freq[None, :]                    # [S, D/2]


def _q_rotary_tables(seq_len, head_dim, base, scale):
    """cos / sin tables for the in-kernel Q path: rotate_half sign folded into
    sin and 1/sqrt(D) folded into both."""
    f = _rope_freqs(seq_len, head_dim, base)
    cos = jnp.concatenate([jnp.cos(f), jnp.cos(f)], axis=-1) * scale
    #  rope(x) = x*cos + concat(-x2, x1)*sin == x*cos + concat(x2, x1)*sin_signed
    sin = jnp.concatenate([-jnp.sin(f), jnp.sin(f)], axis=-1) * scale
    return cos, sin


def _apply_rope_host(x_bshd, base):
    """Standard rotate_half rope on [B, S, H, D]; used for K, computed ONCE in
    plain XLA (fuses into the head-split transpose)."""
    D = x_bshd.shape[-1]
    f = _rope_freqs(x_bshd.shape[1], D, base)
    cos = jnp.concatenate([jnp.cos(f), jnp.cos(f)], axis=-1)
    sin = jnp.concatenate([jnp.sin(f), jnp.sin(f)], axis=-1)
    xf = x_bshd.astype(jnp.float32)
    x1, x2 = xf[..., : D // 2], xf[..., D // 2:]
    rotated = jnp.concatenate([-x2, x1], axis=-1)
    return (xf * cos[None, :, None, :]
            + rotated * sin[None, :, None, :]).astype(x_bshd.dtype)


def _pick_q_tile(sq, max_tile=256):
    """Largest 128-aligned divisor of sq up to max_tile; falls back to a single
    full-sequence block for small / awkward lengths (demo: Sq=8 -> Tq=8)."""
    if sq <= max_tile:
        return sq
    for cand in range(max_tile, 127, -128):
        if sq % cand == 0:
            return cand
    # NOTE: this fallback can blow up VMEM for awkward Sq; pad Sq upstream.
    return sq


def _pick_heads_per_block(num_heads, cap=4):
    """Largest divisor of num_heads up to `cap`.  Reduce (or pass 1) for very
    long Skv on v7x, since resident K/V VMEM scales with heads_per_block."""
    for cand in range(min(num_heads, cap), 0, -1):
        if num_heads % cand == 0:
            return cand
    return 1


def rotary_attention_core(query, key, value, attention_mask, *, num_heads,
                          rotary_base=10000.0, max_q_tile=256,
                          heads_per_block=None, vmem_limit_bytes=None,
                          resident_buffer_count=None):
    """Pallas implementation of RotaryAttentionCore.forward.

    query : [B, Sq, hidden]       key/value : [B, Skv, hidden]
    attention_mask : additive mask broadcastable to [B, num_heads, Sq, Skv]
                     (batch / head broadcast handled via index_map), or None.
    returns (output [B, Sq, hidden], probs [B, num_heads, Sq, Skv])

    Tuning notes:
      v5e/v6e : raise vmem_limit_bytes (e.g. 96-100 MiB) and let max_q_tile
                grow to 512 for long Sq.
      v7x     : cap vmem_limit_bytes at ~56 MiB, keep max_q_tile<=256, pass
                resident_buffer_count=1 (single-buffers resident K/V) and
                heads_per_block=1..2 for long Skv.
    """
    B, Sq, hidden = query.shape
    Skv = key.shape[1]
    assert hidden % num_heads == 0
    H = num_heads
    D = hidden // H

    # ---- head split (plain JAX).  K gets its rotary applied ONCE here and is
    # stored pre-transposed [B, H, D, Skv] -> native MXU contraction in-kernel.
    # TODO(synk): for production shapes the split/merge transposes could be
    # folded into the kernel by processing a head block straight from the
    # [B, S, hidden] layout (feasible within 128 MiB VMEM on v5e/v6e).
    q4 = query.reshape(B, Sq, H, D).transpose(0, 2, 1, 3)            # [B,H,Sq,D]
    k_rot = _apply_rope_host(key.reshape(B, Skv, H, D), rotary_base)  # [B,Skv,H,D]
    k4t = k_rot.transpose(0, 2, 3, 1)                                 # [B,H,D,Skv]
    v4 = value.reshape(B, Skv, H, D).transpose(0, 2, 1, 3)            # [B,H,Skv,D]

    # Q rotary stays fused in-kernel; 1/sqrt(D) folded into the Q tables.
    cos_q, sin_q = _q_rotary_tables(Sq, D, rotary_base, 1.0 / math.sqrt(D))

    Tq = _pick_q_tile(Sq, max_q_tile)
    HB = heads_per_block if heads_per_block is not None else _pick_heads_per_block(H)
    assert H % HB == 0, "heads_per_block must divide num_heads"
    grid = (B, H // HB, Sq // Tq)              # q-tile axis innermost (arbitrary)
    use_roll = (D % 128 == 0)                  # safe lane-roll only then

    # Resident (index-constant along qi) blocks can be single-buffered on v7x.
    kv_mode = ({"pipeline_mode": pl.Buffered(resident_buffer_count)}
               if resident_buffer_count is not None else {})

    inputs = [q4, k4t, v4, cos_q, sin_q]
    in_specs = [
        pl.BlockSpec((1, HB, Tq, D), lambda b, hi, qi: (b, hi, qi, 0)),
        pl.BlockSpec((1, HB, D, Skv), lambda b, hi, qi: (b, hi, 0, 0), **kv_mode),
        pl.BlockSpec((1, HB, Skv, D), lambda b, hi, qi: (b, hi, 0, 0), **kv_mode),
        pl.BlockSpec((Tq, D), lambda b, hi, qi: (qi, 0)),
        pl.BlockSpec((Tq, D), lambda b, hi, qi: (qi, 0)),
    ]

    has_mask = attention_mask is not None
    if has_mask:
        m = jnp.asarray(attention_mask)
        while m.ndim < 4:
            m = m[None]
        mB, mH = m.shape[0], m.shape[1]
        assert mB in (1, B) and mH in (1, H)
        if m.shape[2:] != (Sq, Skv):
            m = jnp.broadcast_to(m, (mB, mH, Sq, Skv))
        # Narrow the additive mask to the query dtype when that is narrower
        # (matches torch, which adds the mask to query-dtype scores) -> halves
        # mask HBM traffic for bf16 models.
        if m.dtype.itemsize > jnp.dtype(query.dtype).itemsize:
            m = m.astype(query.dtype)
        inputs.append(m)
        bsel = (lambda b: b) if mB == B else (lambda b: 0)
        if mH == H:
            in_specs.append(pl.BlockSpec(
                (1, HB, Tq, Skv),
                lambda b, hi, qi, _bs=bsel: (_bs(b), hi, qi, 0)))
        else:
            # head-broadcast mask: one (Tq, Skv) tile DMA amortized over the
            # HB heads of this program instead of re-streamed per head.
            in_specs.append(pl.BlockSpec(
                (1, 1, Tq, Skv),
                lambda b, hi, qi, _bs=bsel: (_bs(b), 0, qi, 0)))

    out_shape = (
        jax.ShapeDtypeStruct((B, H, Sq, D), query.dtype),
        # probs in the input dtype (matches torch.softmax dtype semantics;
        # halves the O(B*H*S^2) writeback for bf16 inputs).
        jax.ShapeDtypeStruct((B, H, Sq, Skv), query.dtype),
    )
    out_specs = (
        pl.BlockSpec((1, HB, Tq, D), lambda b, hi, qi: (b, hi, qi, 0)),
        pl.BlockSpec((1, HB, Tq, Skv), lambda b, hi, qi: (b, hi, qi, 0)),
    )

    def attn_kernel(*refs):
        if has_mask:
            q_r, k_r, v_r, cq, sq_, m_r, o_r, p_r = refs
        else:
            q_r, k_r, v_r, cq, sq_, o_r, p_r = refs
            m_r = None
        _attn_tile_body(q_r, k_r, v_r, cq, sq_, m_r, o_r, p_r,
                        head_dim=D, use_roll=use_roll)

    # TODO(synk): for v7x with very long Skv (single (Tq,Skv) tile + resident
    # K/V not fitting 64 MiB), add an inner kv-tile axis with online max/sum
    # (flash-style) instead of shrinking Tq further.
    out4, probs = pl.pallas_call(
        attn_kernel,
        out_shape=out_shape,
        grid=grid,
        in_specs=in_specs,
        out_specs=out_specs,
        compiler_params=pltpu.CompilerParams(
            dimension_semantics=("parallel", "parallel", "arbitrary"),
            vmem_limit_bytes=vmem_limit_bytes),
    )(*inputs)

    # merge heads: [B, H, Sq, D] -> [B, Sq, hidden]
    output = out4.transpose(0, 2, 1, 3).reshape(B, Sq, hidden)
    return output, probs


# --------------------------------------------------------------------------- #
# Pure-JAX reference (independent of the kernel's folded tables / layouts)    #
# --------------------------------------------------------------------------- #
def _reference(query, key, value, attention_mask, num_heads, rotary_base=10000.0):
    B, Sq, hidden = query.shape
    Skv = key.shape[1]
    D = hidden // num_heads

    def tables(s):
        inv_freq = 1.0 / (rotary_base ** (jnp.arange(0, D, 2, dtype=jnp.float32) / D))
        pos = jnp.arange(s, dtype=jnp.float32)
        freqs = pos[:, None] * inv_freq[None, :]
        emb = jnp.concatenate([freqs, freqs], axis=-1)
        return jnp.cos(emb), jnp.sin(emb)

    def rot(x, s):
        cos, sin = tables(s)
        xh = x.reshape(B, s, num_heads, D)
        x1, x2 = xh[..., : D // 2], xh[..., D // 2:]
        rotated = jnp.concatenate([-x2, x1], axis=-1)
        return (xh * cos[None, :, None, :] + rotated * sin[None, :, None, :]
                ).reshape(B, s, hidden)

    def split_heads(x, s):
        return x.reshape(B, s, num_heads, D).transpose(0, 2, 1, 3)

    q = split_heads(rot(query, Sq), Sq)
    k = split_heads(rot(key, Skv), Skv)
    v = split_heads(value, Skv)
    scores = jnp.einsum("bhqd,bhkd->bhqk", q, k) / math.sqrt(D)
    if attention_mask is not None:
        scores = scores + attention_mask
    probs = jax.nn.softmax(scores, axis=-1)
    out = jnp.einsum("bhqk,bhkd->bhqd", probs, v)
    return out.transpose(0, 2, 1, 3).reshape(B, Sq, hidden), probs


# --------------------------------------------------------------------------- #
# Demo / correctness check                                                    #
# --------------------------------------------------------------------------- #
if __name__ == "__main__":
    # Small shapes consistent with the module: batch=2, seq=8, hidden=32, heads=4.
    B, S, HIDDEN, NUM_HEADS = 2, 8, 32, 4

    root = jax.random.PRNGKey(0)
    kq, kk, kv, km = jax.random.split(root, 4)
    query = jax.random.normal(kq, (B, S, HIDDEN), jnp.float32)
    key = jax.random.normal(kk, (B, S, HIDDEN), jnp.float32)
    value = jax.random.normal(kv, (B, S, HIDDEN), jnp.float32)
    # additive attention mask (0 = keep, -1e9 = masked), broadcast over heads
    attention_mask = jnp.where(
        jax.random.uniform(km, (B, 1, S, S)) > 0.1, 0.0, -1e9
    ).astype(jnp.float32)

    # Tolerances have headroom for the approx-reciprocal (+ Newton refinement)
    # softmax normalization and the table-folded 1/sqrt(D) scaling.
    RTOL = ATOL = 1e-3

    out, probs = rotary_attention_core(
        query, key, value, attention_mask, num_heads=NUM_HEADS)
    out, probs = jax.block_until_ready((out, probs))

    ref_out, ref_probs = _reference(query, key, value, attention_mask, NUM_HEADS)
    assert out.shape == (B, S, HIDDEN)
    assert probs.shape == (B, NUM_HEADS, S, S)
    assert jnp.allclose(out, ref_out, rtol=RTOL, atol=ATOL)
    assert jnp.allclose(probs, ref_probs, rtol=RTOL, atol=ATOL)

    # mask=None path exercises the dedicated no-mask kernel variant
    # (no zero-mask allocation or DMA at all).
    out_nm, probs_nm = rotary_attention_core(
        query, key, value, None, num_heads=NUM_HEADS)
    out_nm, probs_nm = jax.block_until_ready((out_nm, probs_nm))
    ref_out_nm, ref_probs_nm = _reference(query, key, value, None, NUM_HEADS)
    assert jnp.allclose(out_nm, ref_out_nm, rtol=RTOL, atol=ATOL)
    assert jnp.allclose(probs_nm, ref_probs_nm, rtol=RTOL, atol=ATOL)

    # also exercise heads_per_block=1 (v7x-style config) for coverage.
    out_h1, probs_h1 = rotary_attention_core(
        query, key, value, attention_mask, num_heads=NUM_HEADS, heads_per_block=1)
    out_h1, probs_h1 = jax.block_until_ready((out_h1, probs_h1))
    assert jnp.allclose(out_h1, ref_out, rtol=RTOL, atol=ATOL)
    assert jnp.allclose(probs_h1, ref_probs, rtol=RTOL, atol=ATOL)

    print("KERNEL_OK")
</pallas_src>

<mosaic_0001>
module attributes {stable_mosaic.version = 11 : i64} {
  func.func @attn_kernel(%arg0: i32, %arg1: i32, %arg2: i32, %arg3: memref<1x4x8x8xf32, #tpu.memory_space<vmem>>, %arg4: memref<1x4x8x8xf32, #tpu.memory_space<vmem>>, %arg5: memref<1x4x8x8xf32, #tpu.memory_space<vmem>>, %arg6: memref<8x8xf32, #tpu.memory_space<vmem>>, %arg7: memref<8x8xf32, #tpu.memory_space<vmem>>, %arg8: memref<1x1x8x8xf32, #tpu.memory_space<vmem>>, %arg9: memref<1x4x8x8xf32, #tpu.memory_space<vmem>>, %arg10: memref<1x4x8x8xf32, #tpu.memory_space<vmem>>) attributes {dimension_semantics = [#tpu.dimension_semantics<parallel>, #tpu.dimension_semantics<parallel>, #tpu.dimension_semantics<arbitrary>], iteration_bounds = array<i64: 2, 1, 1>, scalar_prefetch = 0 : i64, scratch_operands = 0 : i64, tpu.core_type = #tpu.core_type<tc>, window_params = [{transform_indices = @transform_0, window_bounds = array<i64: 1, 4, 8, 8>}, {transform_indices = @transform_1, window_bounds = array<i64: 1, 4, 8, 8>}, {transform_indices = @transform_2, window_bounds = array<i64: 1, 4, 8, 8>}, {transform_indices = @transform_3, window_bounds = array<i64: 8, 8>}, {transform_indices = @transform_4, window_bounds = array<i64: 8, 8>}, {transform_indices = @transform_5, window_bounds = array<i64: 1, 1, 8, 8>}, {transform_indices = @transform_6, window_bounds = array<i64: 1, 4, 8, 8>}, {transform_indices = @transform_7, window_bounds = array<i64: 1, 4, 8, 8>}]} {
    %c0 = arith.constant 0 : index
    %c0_0 = arith.constant 0 : index
    %c0_1 = arith.constant 0 : index
    %c0_2 = arith.constant 0 : index
    %0 = vector.load %arg3[%c0, %c0_0, %c0_1, %c0_2] : memref<1x4x8x8xf32, #tpu.memory_space<vmem>>, vector<1x4x8x8xf32>
    %1 = vector.shape_cast %0 : vector<1x4x8x8xf32> to vector<4x8x8xf32>
    %2 = vector.extract_strided_slice %1 {offsets = [0, 0, 4], sizes = [4, 8, 4], strides = [1, 1, 1]} : vector<4x8x8xf32> to vector<4x8x4xf32>
    %3 = vector.extract_strided_slice %1 {offsets = [0, 0, 0], sizes = [4, 8, 4], strides = [1, 1, 1]} : vector<4x8x8xf32> to vector<4x8x4xf32>
    %4 = tpu.concatenate %2, %3 in 2 : vector<4x8x4xf32>, vector<4x8x4xf32> -> vector<4x8x8xf32>
    %c0_3 = arith.constant 0 : index
    %c0_4 = arith.constant 0 : index
    %5 = vector.load %arg6[%c0_3, %c0_4] : memref<8x8xf32, #tpu.memory_space<vmem>>, vector<8x8xf32>
    %6 = vector.shape_cast %5 : vector<8x8xf32> to vector<1x8x8xf32>
    %7 = vector.broadcast %6 : vector<1x8x8xf32> to vector<4x8x8xf32>
    %8 = arith.mulf %1, %7 : vector<4x8x8xf32>
    %c0_5 = arith.constant 0 : index
    %c0_6 = arith.constant 0 : index
    %9 = vector.load %arg7[%c0_5, %c0_6] : memref<8x8xf32, #tpu.memory_space<vmem>>, vector<8x8xf32>
    %10 = vector.shape_cast %9 : vector<8x8xf32> to vector<1x8x8xf32>
    %11 = vector.broadcast %10 : vector<1x8x8xf32> to vector<4x8x8xf32>
    %12 = arith.mulf %4, %11 : vector<4x8x8xf32>
    %13 = arith.addf %8, %12 : vector<4x8x8xf32>
    %c0_7 = arith.constant 0 : index
    %c0_8 = arith.constant 0 : index
    %c0_9 = arith.constant 0 : index
    %c0_10 = arith.constant 0 : index
    %14 = vector.load %arg4[%c0_7, %c0_8, %c0_9, %c0_10] : memref<1x4x8x8xf32, #tpu.memory_space<vmem>>, vector<1x4x8x8xf32>
    %15 = vector.shape_cast %14 : vector<1x4x8x8xf32> to vector<4x8x8xf32>
    "tpu.trace_start"() <{level = 10 : i32, message = "hqd,hdk->hqk"}> : () -> ()
    %cst = arith.constant dense<0.000000e+00> : vector<4x8x8xf32>
    %16 = tpu.matmul %13, %15, %cst {dimension_numbers = #tpu.dot_dimension_numbers<[2], [1], [1], [2], [0, 0, 0, 1, 1, 2], [0], [0]>} : vector<4x8x8xf32>, vector<4x8x8xf32>, vector<4x8x8xf32> -> vector<4x8x8xf32>
    "tpu.trace_stop"() : () -> ()
    %c0_11 = arith.constant 0 : index
    %c0_12 = arith.constant 0 : index
    %c0_13 = arith.constant 0 : index
    %c0_14 = arith.constant 0 : index
    %17 = vector.load %arg8[%c0_11, %c0_12, %c0_13, %c0_14] : memref<1x1x8x8xf32, #tpu.memory_space<vmem>>, vector<1x1x8x8xf32>
    %18 = vector.shape_cast %17 : vector<1x1x8x8xf32> to vector<1x8x8xf32>
    %19 = vector.broadcast %18 : vector<1x8x8xf32> to vector<4x8x8xf32>
    %20 = arith.addf %16, %19 : vector<4x8x8xf32>
    %cst_15 = arith.constant dense<0xFF800000> : vector<4x8xf32>
    %21 = vector.multi_reduction <maximumf>, %20, %cst_15 [2] : vector<4x8x8xf32> to vector<4x8xf32>
    %22 = vector.shape_cast %21 : vector<4x8xf32> to vector<4x8x1xf32>
    %23 = vector.broadcast %22 : vector<4x8x1xf32> to vector<4x8x8xf32>
    %24 = arith.subf %20, %23 : vector<4x8x8xf32>
    %25 = math.exp %24 : vector<4x8x8xf32>
    %cst_16 = arith.constant dense<0.000000e+00> : vector<4x8xf32>
    %26 = vector.multi_reduction <add>, %25, %cst_16 [2] : vector<4x8x8xf32> to vector<4x8xf32>
    %27 = vector.shape_cast %26 : vector<4x8xf32> to vector<4x8x1xf32>
    %28 = tpu.reciprocal %27 {approx = true} : vector<4x8x1xf32> -> vector<4x8x1xf32>
    %29 = arith.mulf %27, %28 : vector<4x8x1xf32>
    %cst_17 = arith.constant 2.000000e+00 : f32
    %30 = vector.broadcast %cst_17 : f32 to vector<4x8x1xf32>
    %31 = arith.subf %30, %29 : vector<4x8x1xf32>
    %32 = arith.mulf %28, %31 : vector<4x8x1xf32>
    %33 = vector.broadcast %32 : vector<4x8x1xf32> to vector<4x8x8xf32>
    %34 = arith.mulf %25, %33 : vector<4x8x8xf32>
    %c0_18 = arith.constant 0 : index
    %c0_19 = arith.constant 0 : index
    %c0_20 = arith.constant 0 : index
    %c0_21 = arith.constant 0 : index
    %35 = vector.load %arg5[%c0_18, %c0_19, %c0_20, %c0_21] : memref<1x4x8x8xf32, #tpu.memory_space<vmem>>, vector<1x4x8x8xf32>
    %36 = vector.shape_cast %35 : vector<1x4x8x8xf32> to vector<4x8x8xf32>
    "tpu.trace_start"() <{level = 10 : i32, message = "hqk,hkd->hqd"}> : () -> ()
    %cst_22 = arith.constant dense<0.000000e+00> : vector<4x8x8xf32>
    %37 = tpu.matmul %34, %36, %cst_22 {dimension_numbers = #tpu.dot_dimension_numbers<[2], [1], [1], [2], [0, 0, 0, 1, 1, 2], [0], [0]>} : vector<4x8x8xf32>, vector<4x8x8xf32>, vector<4x8x8xf32> -> vector<4x8x8xf32>
    "tpu.trace_stop"() : () -> ()
    %c0_23 = arith.constant 0 : index
    %c0_24 = arith.constant 0 : index
    %c0_25 = arith.constant 0 : index
    %c0_26 = arith.constant 0 : index
    %38 = vector.load %arg9[%c0_23, %c0_24, %c0_25, %c0_26] : memref<1x4x8x8xf32, #tpu.memory_space<vmem>>, vector<1x4x8x8xf32>
    %39 = vector.shape_cast %38 : vector<1x4x8x8xf32> to vector<4x8x8xf32>
    %40 = vector.shape_cast %37 : vector<4x8x8xf32> to vector<1x4x8x8xf32>
    tpu.vector_store %arg9[%c0_23, %c0_24, %c0_25, %c0_26], %40 {strides = array<i32>} : memref<1x4x8x8xf32, #tpu.memory_space<vmem>>, vector<1x4x8x8xf32>,
    %c0_27 = arith.constant 0 : index
    %c0_28 = arith.constant 0 : index
    %c0_29 = arith.constant 0 : index
    %c0_30 = arith.constant 0 : index
    %41 = vector.load %arg10[%c0_27, %c0_28, %c0_29, %c0_30] : memref<1x4x8x8xf32, #tpu.memory_space<vmem>>, vector<1x4x8x8xf32>
    %42 = vector.shape_cast %41 : vector<1x4x8x8xf32> to vector<4x8x8xf32>
    %43 = vector.shape_cast %34 : vector<4x8x8xf32> to vector<1x4x8x8xf32>
    tpu.vector_store %arg10[%c0_27, %c0_28, %c0_29, %c0_30], %43 {strides = array<i32>} : memref<1x4x8x8xf32, #tpu.memory_space<vmem>>, vector<1x4x8x8xf32>,
    return
  }
  func.func @transform_0(%arg0: i32, %arg1: i32, %arg2: i32) -> (i32, i32, i32, i32) {
    %c0_i32 = arith.constant 0 : i32
    %c0_i32_0 = arith.constant 0 : i32
    return %arg0, %arg1, %arg2, %c0_i32 : i32, i32, i32, i32
  }
  func.func @transform_1(%arg0: i32, %arg1: i32, %arg2: i32) -> (i32, i32, i32, i32) {
    %c0_i32 = arith.constant 0 : i32
    %c0_i32_0 = arith.constant 0 : i32
    %c0_i32_1 = arith.constant 0 : i32
    return %arg0, %arg1, %c0_i32, %c0_i32_0 : i32, i32, i32, i32
  }
  func.func @transform_2(%arg0: i32, %arg1: i32, %arg2: i32) -> (i32, i32, i32, i32) {
    %c0_i32 = arith.constant 0 : i32
    %c0_i32_0 = arith.constant 0 : i32
    %c0_i32_1 = arith.constant 0 : i32
    return %arg0, %arg1, %c0_i32, %c0_i32_0 : i32, i32, i32, i32
  }
  func.func @transform_3(%arg0: i32, %arg1: i32, %arg2: i32) -> (i32, i32) {
    %c0_i32 = arith.constant 0 : i32
    %c0_i32_0 = arith.constant 0 : i32
    return %arg2, %c0_i32 : i32, i32
  }
  func.func @transform_4(%arg0: i32, %arg1: i32, %arg2: i32) -> (i32, i32) {
    %c0_i32 = arith.constant 0 : i32
    %c0_i32_0 = arith.constant 0 : i32
    return %arg2, %c0_i32 : i32, i32
  }
  func.func @transform_5(%arg0: i32, %arg1: i32, %arg2: i32) -> (i32, i32, i32, i32) {
    %c0_i32 = arith.constant 0 : i32
    %c0_i32_0 = arith.constant 0 : i32
    %c0_i32_1 = arith.constant 0 : i32
    return %arg0, %c0_i32, %arg2, %c0_i32_0 : i32, i32, i32, i32
  }
  func.func @transform_6(%arg0: i32, %arg1: i32, %arg2: i32) -> (i32, i32, i32, i32) {
    %c0_i32 = arith.constant 0 : i32
    %c0_i32_0 = arith.constant 0 : i32
    return %arg0, %arg1, %arg2, %c0_i32 : i32, i32, i32, i32
  }
  func.func @transform_7(%arg0: i32, %arg1: i32, %arg2: i32) -> (i32, i32, i32, i32) {
    %c0_i32 = arith.constant 0 : i32
    %c0_i32_0 = arith.constant 0 : i32
    return %arg0, %arg1, %arg2, %c0_i32 : i32, i32, i32, i32
  }
}

</mosaic_0001>

<bundles_post_ra>
// kernel: tpu_custom_call.1
= control target key start
LH: loop header
LB: loop body
LE: loop exit
PB: predicated region body
PF: predicated region fallthrough
CT: control target
= control target key end

     0   :  { %s2446_s0 = inlined_call_operand.hbm [shape: f32[2,4,8,8], index: 0, kind: input, shape index: {}]   ;;  %s2447_s1 = inlined_call_operand.hbm [shape: f32[2,4,8,8], index: 1, kind: input, shape index: {}]   ;;  %s2448_s2 = inlined_call_operand.hbm [shape: f32[2,4,8,8], index: 2, kind: input, shape index: {}]   ;;  %s2449_s3 = inlined_call_operand.hbm [shape: f32[8,8], index: 3, kind: input, shape index: {}]   ;;  %s2450_s4 = inlined_call_operand.hbm [shape: f32[8,8], index: 4, kind: input, shape index: {}]   ;;  %s2451_s5 = inlined_call_operand.hbm [shape: f32[2,1,8,8], index: 5, kind: input, shape index: {}]   ;;  %s2452_s6 = inlined_call_operand.hbm [shape: f32[2,4,8,8], index: 6, kind: output, shape index: {0}]   ;;  %s2453_s7 = inlined_call_operand.hbm [shape: f32[2,4,8,8], index: 7, kind: output, shape index: {1}]  }
   0x1   :  { %2467 = sst [smem:[#allocation26_spill]] %s2446_s0 }
   0x2   :  { %2468 = sst [smem:[#allocation27_spill]] %s2447_s1 }
   0x3   :  { %2469 = sst [smem:[#allocation28_spill]] %s2449_s3 }
   0x4   :  { %2470 = sst [smem:[#allocation29_spill]] %s2452_s6 }
   0x5   :  { %2471 = sst [smem:[#allocation30_spill]] %s2453_s7 }
   0x6   :  { %13 = vsyncpa [#allocation3], 0 }
   0x7   :  { %15 = vsyncpa [#allocation3 + $0x1], 0 }
   0x8   :  { %16 = vsyncpa [#allocation6], 0 }
   0x9   :  { %18 = vsyncpa [#allocation6 + $0x1], 0 }
   0xa   :  { %19 = vsyncpa [#allocation9], 0 }
   0xb   :  { %20 = vsyncpa [#allocation12], 0 }
   0xc   :  { %22 = vsyncpa [#allocation12 + $0x1], 0 }
   0xd   :  { %23 = vsyncpa [#allocation4], 0 }
   0xe   :  { %25 = vsyncpa [#allocation4 + $0x1], 0 }
   0xf   :  { %26 = vsyncpa [#allocation15], 0 }
  0x10   :  { %28 = vsyncpa [#allocation15 + $0x1], 0  ;;  %s2059_s24 = smov 0   ;;  %s2061_s25 = smov 0  }
  0x11   :  { %s2063_s26 = smov 0   ;;  %s2065_s27 = smov 0  }
  0x12   :  { %s2067_s28 = smov 0   ;;  %s2069_s29 = smov 0  }
  0x13 LB: > { %2472 = sst [smem:[#allocation22_spill]] %s1981_s24  ;;  %s2090_s30 = sadd.s32 4294967295, %s2001_s29   ;;  %s2001_s29 = sphi %s2069_s29, %s34_s29   ;;  %s1997_s28 = sphi %s2067_s28, %s2505_s28   ;;  %s1993_s27 = sphi %s2065_s27, %s2504_s27   ;;  %s1989_s26 = sphi %s2063_s26, %s2503_s26   ;;  %s1985_s25 = sphi %s2061_s25, %s2502_s25   ;;  %s1981_s24 = sphi %s2059_s24, %s2501_s24  }
  0x14   : > { %2473 = sst [smem:[#allocation23_spill]] %s1993_s27  ;;  %s1486_s8 = sadd.s32 4294967294, %s2001_s29  }
  0x15   : > { %s64_s9 = sadd.s32 1, %s1989_s26  ;;  %p71_p0 = scmp.ne.s32.totalorder %s1989_s26, %s1985_s25 }
  0x16   : > { %p72_p1 = scmp.eq.s32.totalorder %s2001_s29, 0  ;;  %p77_p2 = scmp.ne.s32.totalorder %s1985_s25, %s1981_s24 }
  0x17   : > { %p2454_p3 = scmp.eq.s32.totalorder %s2090_s30, 0  ;;  %p241_p4 = scmp.eq.s32.totalorder %s2090_s30, 1 }
  0x18   : > { %p2101_p5 = por %p72_p1, %p71_p0  ;;  %p247_p6 = scmp.eq.s32.totalorder %s1486_s8, 1 }
  0x19   : > { %p2107_p7 = por %p2454_p3, %p77_p2  ;;  %p2111_p8 = por %p241_p4, %p71_p0 }
  0x1a   : > { %p2115_p9 = por %p247_p6, %p77_p2  ;;  %p1487_p10 = scmp.ge.s32.totalorder %s2001_s29, 1 }
  0x1b   : > { %s2476_s12 = scalar_select %p2111_p8, 1, 0 }
  0x1c   : > { %s2478_s13 = scalar_select %p2115_p9, 1, 0 }
  0x1d   : > { %2477 = sst [smem:[#allocation24_spill]] %s2476_s12  ;;  %p284_p11 = scmp.lt.s32.totalorder %s2001_s29, 3 }
  0x1e   : > { %2479 = sst [smem:[#allocation25_spill]] %s2478_s13  ;;  %s2003_s15 = smov [#allocation8]  }
  0x1f   : > { %p2122_p13 = pnand %p1487_p10, %p284_p11  ;;  %s299_s16 = sshll.u32 %s2003_s15, 4  ;;  %s300_s16 = int_to_ptr.vmem [resolvable:$true] %s299_s16 }
  0x20   : > { %p1637_p1 = scmp.lt.s32.totalorder %s2001_s29, 2  ;;  %s53_s19 = sadd.s32 1, %s1997_s28 }
  0x21   : > { %p1608_p0 = pneg %p2122_p13  ;;  %p55_p6 = scmp.ge.s32.totalorder %s53_s19, 2 }
  0x22   : > { %p2131_p4 = pnand %p1637_p1, %p2101_p5  ;;  %s2143_s20 = sand.u32 1, %s1989_s26  }
  0x23   : > { %p2137_p2 = pnand %p1608_p0, %p2454_p3  ;;  %s1726_s21 = scalar_lea.vmem %s300_s16, 128 }
  0x24   : > { %p1727_p11 = scmp.ne.s32.totalorder %s300_s16, %s1726_s21  ;;  %p1734_p12 = scmp.lt.s32.totalorder %s300_s16, %s300_s16 }
  0x25   : > { %p1717_p10 = pneg %p2137_p2  ;;  %p1735_p9 = scmp.lt.s32.totalorder %s1726_s21, %s1726_s21 }
  0x27   : > { %p1729_p5 = pnand %p1727_p11, %p1717_p10  ;;  %p1736_p0 = por %p1735_p9, %p1734_p12 }
  0x29   : > { %p1730_p1 = pneg %p1729_p5 }
  0x2b   : > { %p1737_p3 = pnand %p1736_p0, %p1730_p1 }
  0x2d   : > { %1740 = shalt.err (!%p1737_p3)
}
  0x2e   : > { %s2483_s3 = sld [smem:[#allocation28_spill]]  ;;  %s2507_s19 = smov (%p55_p6, %s53_s19), 0 }
  0x2f   : > { %s2158_s8 = sshll.u32 %s2143_s20, 5  ;;  %s2161_s10 = sshll.u32 %s1997_s28, 9 }
  0x30   : > { %s57_s15 = ssub.s32 %s1997_s28, %s2507_s19  ;;  %s347_s21 = sand.u32 1, %s2001_s29  }
  0x31   : > { %p62_p3 = scmp.eq.s32.totalorder %s57_s15, 0  ;;  %s2484_s1 = sld [smem:[#allocation27_spill]] }
  0x32   : > { %s2004_s6 = smov [#allocation10]   ;;  %s2176_s12 = scalar_lea.sflag [#allocation6], %s347_s21 }
  0x33   : > { %s2169_s22 = scalar_select %p62_p3, %s1989_s26, %s64_s9  }
  0x34   : > { %1611 = dma.hbm_to_vmem [thread:$0]  (!%p2137_p2), %s2483_s3, 128, %s300_s16, [#allocation9]  }
  0x35   : > { %s351_s3 = scalar_lea.vmem [#allocation5], %s2158_s8  ;;  %s312_s7 = sshll.u32 %s2004_s6, 4  ;;  %s313_s7 = int_to_ptr.vmem [resolvable:$true] %s312_s7 }
  0x36   : > { %s360_s24 = sshll.u32 %s351_s3, 4  ;;  %p2462_p9 = pneg %p2131_p4  ;;  %s361_s24 = int_to_ptr.vmem [resolvable:$true] %s360_s24 }
  0x37   : > { %s359_s16 = scalar_lea.hbm %s2484_s1, %s2161_s10  ;;  %s1754_s27 = scalar_lea.vmem %s361_s24, 512 }
  0x38   : > { %p1755_p12 = scmp.ne.s32.totalorder %s361_s24, %s1754_s27  ;;  %s2005_s9 = smov [#allocation5]  }
  0x39   : > { %s1759_s15 = sshll.u32 %s2005_s9, 4  ;;  %s1760_s15 = int_to_ptr.vmem [resolvable:$false] %s1759_s15 }
  0x3a   : > { %p1757_p6 = pnand %p1755_p12, %p2462_p9  ;;  %s1761_s13 = scalar_lea.vmem %s1760_s15, 1024 }
  0x3b   : > { %p1762_p5 = scmp.lt.s32.totalorder %s361_s24, %s1760_s15  ;;  %p1763_p1 = scmp.lt.s32.totalorder %s1761_s13, %s1754_s27 }
  0x3c   : > { %p1758_p11 = pneg %p1757_p6 }
  0x3d   : > { %p1764_p0 = por %p1763_p1, %p1762_p5 }
  0x3f   : > { %p1765_p3 = pnand %p1764_p0, %p1758_p11 }
  0x41   : > { %1768 = shalt.err (!%p1765_p3)
}
  0x42   : > { %s2463_s3 = smov 128   ;;  %s2465_s6 = smov 8  }
  0x43   : > { %1621 = dma.hbm_to_vmem [thread:$0]  (!%p2131_p4), %s359_s16, 512, %s361_s24, %s2176_s12, %s2463_s3, %s2463_s3, %s2465_s6  }
  0x44   : > { %s1780_s21 = scalar_lea.vmem %s313_s7, 128  ;;  %p1788_p5 = scmp.lt.s32.totalorder %s313_s7, %s313_s7 }
  0x45   : > { %p1781_p12 = scmp.ne.s32.totalorder %s313_s7, %s1780_s21  ;;  %p1789_p11 = scmp.lt.s32.totalorder %s1780_s21, %s1780_s21 }
  0x47   : > { %p1783_p6 = pnand %p1781_p12, %p1717_p10  ;;  %p1790_p1 = por %p1789_p11, %p1788_p5 }
  0x49   : > { %p1784_p9 = pneg %p1783_p6 }
  0x4b   : > { %p1791_p0 = pnand %p1790_p1, %p1784_p9 }
  0x4d   : > { %1794 = shalt.err (!%p1791_p0)
}
  0x4e   : > { %1614 = dma.hbm_to_vmem [thread:$0]  (!%p2137_p2), %s2450_s4, 128, %s313_s7, [#allocation9]  }
  0x4f   : > { %s2485_s0 = sld [smem:[#allocation26_spill]]  ;;  %s327_s15 = scalar_lea.vmem [#allocation2], %s2158_s8 }
  0x50   : > { %s337_s13 = sshll.u32 %s327_s15, 4  ;;  %s382_s18 = scalar_lea.hbm %s2448_s2, %s2161_s10  ;;  %s338_s13 = int_to_ptr.vmem [resolvable:$true] %s337_s13 }
  0x51   : > { %s324_s6 = scalar_lea.sflag [#allocation3], %s2143_s20  ;;  %s1808_s1 = scalar_lea.vmem %s338_s13, 512 }
  0x52   : > { %p1809_p10 = scmp.ne.s32.totalorder %s338_s13, %s1808_s1  ;;  %p2486_p9 = pneg %p2131_p4 }
  0x53   : > { %s2008_s27 = smov [#allocation2]  }
  0x54   : > { %p1811_p3 = pnand %p1809_p10, %p2486_p9  ;;  %s1813_s7 = sshll.u32 %s2008_s27, 4  ;;  %s1814_s7 = int_to_ptr.vmem [resolvable:$false] %s1813_s7 }
  0x55   : > { %s336_s9 = scalar_lea.hbm %s2485_s0, %s2161_s10  ;;  %s1815_s23 = scalar_lea.vmem %s1814_s7, 1024 }
  0x56   : > { %p1812_p12 = pneg %p1811_p3  ;;  %p1816_p2 = scmp.lt.s32.totalorder %s338_s13, %s1814_s7 }
  0x57   : > { %p1817_p6 = scmp.lt.s32.totalorder %s1815_s23, %s1808_s1 }
  0x59   : > { %p1818_p5 = por %p1817_p6, %p1816_p2 }
  0x5b   : > { %p1819_p11 = pnand %p1818_p5, %p1812_p12 }
  0x5d   : > { %1822 = shalt.err (!%p1819_p11)
}
  0x5e   : > { %s2487_s3 = smov 8   ;;  %s2488_s24 = smov 128  }
  0x5f   : > { %1618 = dma.hbm_to_vmem [thread:$0]  (!%p2131_p4), %s336_s9, 512, %s338_s13, %s324_s6, %s2488_s24, %s2488_s24, %s2487_s3  }
  0x60   : > { %s374_s16 = scalar_lea.vmem [#allocation7], %s2158_s8  ;;  %s1500_s21 = sshll.u32 %s2143_s20, 3 }
  0x61   : > { %s383_s15 = sshll.u32 %s374_s16, 4  ;;  %p2489_p0 = pmov %p2486_p9  ;;  %s384_s15 = int_to_ptr.vmem [resolvable:$true] %s383_s15 }
  0x62   : > { %s1836_s27 = scalar_lea.vmem %s384_s15, 512  ;;  %s2009_s1 = smov [#allocation7]  }
  0x63   : > { %p1837_p1 = scmp.ne.s32.totalorder %s384_s15, %s1836_s27  ;;  %s1841_s7 = sshll.u32 %s2009_s1, 4  ;;  %s1842_s7 = int_to_ptr.vmem [resolvable:$false] %s1841_s7 }
  0x64   : > { %s1843_s23 = scalar_lea.vmem %s1842_s7, 1024  ;;  %p1844_p3 = scmp.lt.s32.totalorder %s384_s15, %s1842_s7 }
  0x65   : > { %p1839_p10 = pnand %p1837_p1, %p2489_p0  ;;  %p1845_p12 = scmp.lt.s32.totalorder %s1843_s23, %s1836_s27 }
  0x67   : > { %p1840_p9 = pneg %p1839_p10  ;;  %p1846_p2 = por %p1845_p12, %p1844_p3 }
  0x69   : > { %p1847_p6 = pnand %p1846_p2, %p1840_p9 }
  0x6b   : > { %1850 = shalt.err (!%p1847_p6)
}
  0x6c   : > { %1624 = dma.hbm_to_vmem [thread:$0]  (!%p2131_p4), %s382_s18, 512, %s384_s15, %s2176_s12, %s2488_s24, %s2488_s24, %s2487_s3  }
  0x6d   : > { %s1501_s9 = sshll.u32 %s1997_s28, 7  ;;  %s397_s1 = scalar_lea.vmem [#allocation11], %s1500_s21 }
  0x6e   : > { %s403_s27 = scalar_lea.hbm %s2451_s5, %s1501_s9  ;;  %s405_s7 = sshll.u32 %s397_s1, 4  ;;  %s406_s7 = int_to_ptr.vmem [resolvable:$true] %s405_s7 }
  0x6f   : > { %s394_s23 = scalar_lea.sflag [#allocation12], %s2143_s20  ;;  %s1864_s0 = scalar_lea.vmem %s406_s7, 128 }
  0x70   : > { %p1865_p5 = scmp.ne.s32.totalorder %s406_s7, %s1864_s0  ;;  %p2490_p11 = pmov %p2489_p0 }
  0x71   : > { %s2010_s10 = smov [#allocation11]  }
  0x72   : > { %p1867_p1 = pnand %p1865_p5, %p2490_p11  ;;  %s1869_s8 = sshll.u32 %s2010_s10, 4  ;;  %s1870_s8 = int_to_ptr.vmem [resolvable:$false] %s1869_s8 }
  0x73   : > { %s1871_s6 = scalar_lea.vmem %s1870_s8, 256  ;;  %p1872_p10 = scmp.lt.s32.totalorder %s406_s7, %s1870_s8 }
  0x74   : > { %p1868_p0 = pneg %p1867_p1  ;;  %p1873_p9 = scmp.lt.s32.totalorder %s1871_s6, %s1864_s0 }
  0x76   : > { %p1874_p3 = por %p1873_p9, %p1872_p10 }
  0x78   : > { %p1875_p12 = pnand %p1874_p3, %p1868_p0 }
  0x7a   : > { %1878 = shalt.err (!%p1875_p12)
}
  0x7b   : > { %1627 = dma.hbm_to_vmem [thread:$0]  (!%p2131_p4), %s403_s27, 128, %s406_s7, %s394_s23  }
  0x7c   : > { %414 = sbr.rel (%p2122_p13) target bundleno = 998 (0x3e6), region = 44  ;;  %s2244_s12 = sand.u32 (!%p2122_p13), 1, %s1985_s25  }
  0x7d   : > { %s2247_s20 = sshll.u32 (!%p2122_p13), %s2244_s12, 5  ;;  %s417_s18 = scalar_lea.sflag (!%p2122_p13), [#allocation3], %s2244_s12 }
  0x7e   : > { %s2251_s0 = scalar_lea.vmem (!%p2122_p13), [#allocation2], %s2247_s20 }
  0x81   : > { %1956 = dma.done.wait (%p2107_p7), %s417_s18, 512  }
  0x82   : > { %1958 = vsyncadd (%p2107_p7), %s417_s18, 4294966784  ;;  %s425_s14 = sand.u32 1, %s2090_s30   ;;  %s2259_s3 = scalar_lea.vmem [#allocation5], %s2247_s20 }
  0x83   : > { %s426_s17 = scalar_lea.sflag [#allocation6], %s425_s14 }
  0x84   : > { %1960 = dma.done.wait (%p2107_p7), %s426_s17, 1024  }
  0x85   : > { %1962 = vsyncadd (%p2107_p7), %s426_s17, 4294966272  ;;  %s2266_s24 = scalar_lea.vmem [#allocation7], %s2247_s20  ;;  %p2491_p13 = scmp.eq.s32.totalorder %s2090_s30, 0 }
  0x87   : > { %1964 = dma.done.wait (%p2491_p13), [#allocation9], 256   ;;  %p2492_p4 = pmov %p2491_p13 }
  0x88   : > { %s1508_s15 = sshll.u32 %s2244_s12, 3  ;;  %s452_s21 = scalar_lea.sflag [#allocation12], %s2244_s12 }
  0x89   : > { %1966 = vsyncadd (%p2492_p4), [#allocation9], 4294967040  ;;  %s2274_s9 = scalar_lea.vmem [#allocation11], %s1508_s15 }
  0x8a   : > { %1968 = dma.done.wait (%p2107_p7), %s452_s21, 128  }
  0x8b   : > { %1970 = vsyncadd (%p2107_p7), %s452_s21, 4294967168  ;;  %v2011_v0 = vmov 0.0   ;;  %vm2012_vm0 = vmmov 0   ;;  %v511_v1 = vld [vmem:[%s2251_s0] sm:$0xff]  ;;  %s2013_s30 = smov 4   ;;  %s2014_s11 = smov 124  }
  0x8c   : > { %1548 = vmatprep.subr.mxu0 %v2011_v0  ;;  %1550 = vmatprep.mubr.msk.f32.mxu0 %vm2012_vm0, %v2011_v0  ;;  %v512_v2 = vld [vmem:[%s2251_s0 + $0x8] sm:$0xff]  ;;  %v562_v3 = vld [vmem:[%s2259_s3] sm:$0xff]  ;;  %v514_v5 = vld [vmem:[%s2251_s0 + $0x18] sm:$0xff]  ;;  %vm543_vm1 = vcmask 31744   ;;  %vm567_vm2 = vcmask 64512   ;;  %s2329_s13 = scalar_lea.vmem [#allocation14], %s2247_s20 }
  0x8d   : > { %1553 = vmatprep.subr.mxu1 %v2011_v0  ;;  %1555 = vmatprep.mubr.msk.f32.mxu1 %vm2012_vm0, %v2011_v0  ;;  %v563_v4 = vld [vmem:[%s2259_s3 + $0x8] sm:$0xff]  ;;  %v513_v6 = vld [vmem:[%s2251_s0 + $0x10] sm:$0xff]  ;;  %v548_v7 = vld [vmem:[#allocation8] sm:$0xff]  ;;  %s2493_s16 = sld [smem:[#allocation23_spill]]  ;;  %s1261_s7 = sshll.u32 %s2329_s13, 4  ;;  %s2357_s7 = int_to_ptr.vmem [resolvable:$true] %s1261_s7 }
  0x8e   : > { %531 = vrot.lane.b32.xlu1 %v511_v1, %s2013_s30  ;;  %519 = vrot.lane.b32.xlu0 %v511_v1, %s2014_s11  ;;  %v553_v8 = vld [vmem:[#allocation10] sm:$0xff]  ;;  %v549_v9 = vmul.f32 %v548_v7, %v511_v1  ;;  %v550_v14 = vmul.f32 %v548_v7, %v512_v2  ;;  %v564_v18 = vld [vmem:[%s2259_s3 + $0x10] sm:$0xff]  ;;  %v565_v24 = vld [vmem:[%s2259_s3 + $0x18] sm:$0xff]  ;;  %v552_v25 = vmul.f32 %v548_v7, %v514_v5  ;;  %s2495_s8 = sld [smem:[#allocation30_spill]]  ;;  %s1226_s18 = scalar_lea.sflag [#allocation15], %s2244_s12 }
  0x8f   : > { %1549 = vmatpush3.msra.mxu0 %v562_v3  ;;  %1554 = vmatpush3.msra.mxu1 %v563_v4  ;;  %v551_v26 = vmul.f32 %v548_v7, %v513_v6  ;;  %v566_v35 = vld [vmem:[%s2274_s9] sm:$0xff]  ;;  %s1879_s0 = scalar_lea.vmem %s2357_s7, 512  ;;  %s2015_s14 = smov [#allocation14]  }
  0x90   : > { %1558 = vmatprep.subr.mxu0 %v2011_v0  ;;  %1563 = vmatprep.subr.mxu1 %v2011_v0  ;;  %p1880_p7 = scmp.ne.s32.totalorder %s2357_s7, %s1879_s0  ;;  %s1883_s17 = sshll.u32 %s2015_s14, 4  ;;  %s1884_s17 = int_to_ptr.vmem [resolvable:$false] %s1883_s17 }
  0x91   : > { %s1885_s3 = scalar_lea.vmem %s1884_s17, 1024  ;;  %p1886_p5 = scmp.lt.s32.totalorder %s2357_s7, %s1884_s17 }
  0x92   : > { %533 = vrot.lane.b32.xlu1 %v512_v2, %s2013_s30  ;;  %521 = vrot.lane.b32.xlu0 %v512_v2, %s2014_s11  ;;  %p1881_p2 = pnand %p1880_p7, %p2111_p8  ;;  %p1887_p11 = scmp.lt.s32.totalorder %s1885_s3, %s1879_s0 }
  0x93   : > { %s1530_s1 = sshll.u32 %s2493_s16, 9 }
  0x94   : > { %s2355_s6 = scalar_lea.hbm %s2495_s8, %s1530_s1  ;;  %p1882_p6 = pneg %p1881_p2 }
  0x95   : > { %p1888_p1 = por %p1887_p11, %p1886_p5 }
  0x96   : > { %525 = vrot.lane.b32.xlu1 %v514_v5, %s2014_s11  ;;  %523 = vrot.lane.b32.xlu0 %v513_v6, %s2014_s11 }
  0x97   : > { %p1889_p0 = pnand %p1888_p1, %p1882_p6 }
  0x9a   : > { %537 = vrot.lane.b32.xlu1 %v514_v5, %s2013_s30  ;;  %535 = vrot.lane.b32.xlu0 %v513_v6, %s2013_s30 }
 0x100   : > { %v532_v10 = vpop.permute.xlu1 %531  ;;  %v520_v11 = vpop.permute.xlu0 %519 }
 0x101   : > { %v544_v12 = vsel %vm543_vm1, %v520_v11, %v532_v10  ;;  %v917_v10 = vld [vmem:[%s2266_s24 + $0x8] sm:$0xff] }
 0x102   : > { %v554_v13 = vmul.f32 %v553_v8, %v544_v12 }
 0x104   : > { %v558_v15 = vadd.f32 %v554_v13, %v549_v9  ;;  %v534_v16 = vpop.permute.xlu1 %533  ;;  %v522_v17 = vpop.permute.xlu0 %521  ;;  %v916_v9 = vld [vmem:[%s2266_s24] sm:$0xff] }
 0x105   : > { %v545_v19 = vsel %vm543_vm1, %v522_v17, %v534_v16 }
 0x106   : > { %v555_v20 = vmul.f32 %v553_v8, %v545_v19  ;;  %1551 = vmatmul.mubr.msk.f32.vlgmr.msra.gmra.mxu0 %vm567_vm2, %v558_v15 }
 0x107   : > { %1559 = vmatpush3.msra.mxu0 %v564_v18  ;;  %1560 = vmatprep.mubr.msk.f32.mxu0 %vm2012_vm0, %v2011_v0 }
 0x108   : > { %v559_v21 = vadd.f32 %v555_v20, %v550_v14  ;;  %v526_v22 = vpop.permute.xlu1 %525  ;;  %v524_v23 = vpop.permute.xlu0 %523  ;;  %1568 = vmatprep.subr.mxu0 %v2011_v0 }
 0x10a   : > { %1556 = vmatmul.mubr.msk.f32.vlgmr.msra.gmra.mxu1 %vm567_vm2, %v559_v21 }
 0x10b   : > { %1564 = vmatpush3.msra.mxu1 %v565_v24  ;;  %1565 = vmatprep.mubr.msk.f32.mxu1 %vm2012_vm0, %v2011_v0 }
 0x10c   : > { %v538_v27 = vpop.permute.xlu1 %537  ;;  %v536_v28 = vpop.permute.xlu0 %535  ;;  %1573 = vmatprep.subr.mxu1 %v2011_v0 }
 0x10d   : > { %v547_v29 = vsel %vm543_vm1, %v526_v22, %v538_v27  ;;  %v546_v30 = vsel %vm543_vm1, %v524_v23, %v536_v28  ;;  %v918_v23 = vld [vmem:[%s2266_s24 + $0x10] sm:$0xff] }
 0x10e   : > { %v557_v31 = vmul.f32 %v553_v8, %v547_v29  ;;  %v556_v32 = vmul.f32 %v553_v8, %v546_v30 }
 0x110   : > { %v561_v33 = vadd.f32 %v557_v31, %v552_v25  ;;  %v560_v34 = vadd.f32 %v556_v32, %v551_v26  ;;  %v919_v26 = vld [vmem:[%s2266_s24 + $0x18] sm:$0xff] }
 0x112   : > { %1561 = vmatmul.mubr.msk.f32.vlgmr.msra.gmra.mxu0 %vm567_vm2, %v560_v34  ;;  %1566 = vmatmul.mubr.msk.f32.vlgmr.msra.gmra.mxu1 %vm567_vm2, %v561_v33 }
 0x113   : > { %1570 = vmatprep.mubr.msk.f32.mxu0 %vm2012_vm0, %v2011_v0  ;;  %1575 = vmatprep.mubr.msk.f32.mxu1 %vm2012_vm0, %v2011_v0 }
 0x114   : > { %1569 = vmatpush3.msra.mxu0 %v916_v9  ;;  %1574 = vmatpush3.msra.mxu1 %v917_v10 }
 0x115   : > { %1578 = vmatprep.subr.mxu0 %v2011_v0  ;;  %1583 = vmatprep.subr.mxu1 %v2011_v0 }
 0x1c6   : > { %v637_v36 = vpop.f32.mrf.mxu0 }
 0x1c7   : > { %v638_v37 = vadd.f32 %v637_v36, %v566_v35 }
 0x1c8   : > { %v1552_v38 = vpop.f32.mrf.mxu0 }
 0x1c9   : > { %v860_v39 = vsel %vm567_vm2, %v638_v37, -inf }
 0x1ca   : > { %v710_v40 = vpop.f32.mrf.mxu1  ;;  %861 = vmax.xlane.f32.xlu0 %v860_v39 }
 0x1cb   : > { %v711_v41 = vadd.f32 %v710_v40, %v566_v35 }
 0x1cc   : > { %v1557_v42 = vpop.f32.mrf.mxu1 }
 0x1cd   : > { %v863_v43 = vsel %vm567_vm2, %v711_v41, -inf }
 0x1ce   : > { %864 = vmax.xlane.f32.xlu1 %v863_v43 }
 0x1d2   : > { %v783_v44 = vpop.f32.mrf.mxu0  ;;  %v856_v45 = vpop.f32.mrf.mxu1 }
 0x1d3   : > { %v784_v46 = vadd.f32 %v783_v44, %v566_v35  ;;  %v857_v49 = vadd.f32 %v856_v45, %v566_v35 }
 0x1d4   : > { %v1562_v47 = vpop.f32.mrf.mxu0  ;;  %v1567_v48 = vpop.f32.mrf.mxu1 }
 0x1d5   : > { %v866_v50 = vsel %vm567_vm2, %v784_v46, -inf  ;;  %v869_v51 = vsel %vm567_vm2, %v857_v49, -inf }
 0x1d6   : > { %867 = vmax.xlane.f32.xlu0 %v866_v50 }
 0x1da   : > { %870 = vmax.xlane.f32.xlu0 %v869_v51 }
 0x253   : > { %v862_v52 = vpop.xlane.xlu0 %861 }
 0x254   : > { %v872_v53 = vsub.f32 %v638_v37, %v862_v52 }
 0x256   : > { %v876_v54 = vmul.f32 1.442695, %v872_v53 }
 0x257   : > { %v865_v55 = vpop.xlane.xlu1 %864 }
 0x258   : > { %1699 = vpow2.f32 %v876_v54  ;;  %v873_v56 = vsub.f32 %v711_v41, %v865_v55 }
 0x25a   : > { %v878_v57 = vmul.f32 1.442695, %v873_v56 }
 0x25c   : > { %1701 = vpow2.f32 %v878_v57 }
 0x25f   : > { %v868_v58 = vpop.xlane.xlu0 %867 }
 0x260   : > { %v874_v59 = vsub.f32 %v784_v46, %v868_v58 }
 0x262   : > { %v880_v60 = vmul.f32 1.442695, %v874_v59 }
 0x263   : > { %v871_v61 = vpop.xlane.xlu0 %870 }
 0x264   : > { %1703 = vpow2.f32 %v880_v60  ;;  %v875_v62 = vsub.f32 %v857_v49, %v871_v61 }
 0x265   : > { %v1700_v63 = vpop.eup %1699 }
 0x266   : > { %v882_v1 = vmul.f32 1.442695, %v875_v62  ;;  %v884_v2 = vsel %vm567_vm2, %v1700_v63, 0.0 }
 0x267   : > { %885 = vadd.xlane.f32.xlu1 %v884_v2 }
 0x268   : > { %1705 = vpow2.f32 %v882_v1 }
 0x269   : > { %v1702_v3 = vpop.eup %1701 }
 0x26a   : > { %v887_v4 = vsel %vm567_vm2, %v1702_v3, 0.0 }
 0x26b   : > { %888 = vadd.xlane.f32.xlu0 %v887_v4 }
 0x271   : > { %v1704_v5 = vpop.eup %1703 }
 0x272   : > { %v890_v6 = vsel %vm567_vm2, %v1704_v5, 0.0 }
 0x273   : > { %891 = vadd.xlane.f32.xlu1 %v890_v6 }
 0x275   : > { %v1706_v7 = vpop.eup %1705 }
 0x276   : > { %v893_v8 = vsel %vm567_vm2, %v1706_v7, 0.0 }
 0x277   : > { %894 = vadd.xlane.f32.xlu0 %v893_v8 }
 0x2f0   : > { %v886_v11 = vpop.xlane.xlu1 %885 }
 0x2f1   : > { %1707 = vrcp.f32 %v886_v11 }
 0x2f4   : > { %v889_v12 = vpop.xlane.xlu0 %888 }
 0x2f5   : > { %1709 = vrcp.f32 %v889_v12 }
 0x2fc   : > { %v892_v13 = vpop.xlane.xlu1 %891 }
 0x2fd   : > { %1711 = vrcp.f32 %v892_v13 }
 0x2fe   : > { %v1708_v14 = vpop.eup %1707 }
 0x2ff   : > { %v900_v15 = vmul.f32 %v1708_v14, %v886_v11 }
 0x300   : > { %v895_v16 = vpop.xlane.xlu0 %894 }
 0x301   : > { %v904_v17 = vsub.f32 2.0, %v900_v15  ;;  %1713 = vrcp.f32 %v895_v16 }
 0x302   : > { %v1710_v18 = vpop.eup %1709 }
 0x303   : > { %v908_v19 = vmul.f32 %v1708_v14, %v904_v17  ;;  %v901_v20 = vmul.f32 %v1710_v18, %v889_v12 }
 0x305   : > { %v912_v21 = vmul.f32 %v1700_v63, %v908_v19  ;;  %v905_v22 = vsub.f32 2.0, %v901_v20 }
 0x307   : > { %1216 = vst.msk [vmem:[%s2329_s13] sm:$0xff] %vm567_vm2, %v912_v21  ;;  %v909_v24 = vmul.f32 %v1710_v18, %v905_v22  ;;  %1571 = vmatmul.mubr.msk.f32.vlgmr.msra.gmra.mxu0 %vm567_vm2, %v912_v21 }
 0x308   : > { %1579 = vmatpush3.msra.mxu0 %v918_v23  ;;  %1580 = vmatprep.mubr.msk.f32.mxu0 %vm2012_vm0, %v2011_v0 }
 0x309   : > { %v913_v25 = vmul.f32 %v1702_v3, %v909_v24 }
 0x30a   : > { %v1712_v27 = vpop.eup %1711 }
 0x30b   : > { %1217 = vst.msk [vmem:[%s2329_s13 + $0x8] sm:$0xff] %vm567_vm2, %v913_v25  ;;  %v902_v28 = vmul.f32 %v1712_v27, %v892_v13  ;;  %1576 = vmatmul.mubr.msk.f32.vlgmr.msra.gmra.mxu1 %vm567_vm2, %v913_v25 }
 0x30c   : > { %1584 = vmatpush3.msra.mxu1 %v919_v26  ;;  %1585 = vmatprep.mubr.msk.f32.mxu1 %vm2012_vm0, %v2011_v0 }
 0x30d   : > { %v906_v29 = vsub.f32 2.0, %v902_v28 }
 0x30e   : > { %v1714_v30 = vpop.eup %1713 }
 0x30f   : > { %v910_v31 = vmul.f32 %v1712_v27, %v906_v29  ;;  %v903_v32 = vmul.f32 %v1714_v30, %v895_v16 }
 0x311   : > { %v914_v33 = vmul.f32 %v1704_v5, %v910_v31  ;;  %v907_v34 = vsub.f32 2.0, %v903_v32 }
 0x313   : > { %1218 = vst.msk [vmem:[%s2329_s13 + $0x10] sm:$0xff] %vm567_vm2, %v914_v33  ;;  %v911_v35 = vmul.f32 %v1714_v30, %v907_v34  ;;  %1581 = vmatmul.mubr.msk.f32.vlgmr.msra.gmra.mxu0 %vm567_vm2, %v914_v33 }
 0x315   : > { %v915_v36 = vmul.f32 %v1706_v7, %v911_v35 }
 0x317   : > { %1219 = vst.msk [vmem:[%s2329_s13 + $0x18] sm:$0xff] %vm567_vm2, %v915_v36  ;;  %1586 = vmatmul.mubr.msk.f32.vlgmr.msra.gmra.mxu1 %vm567_vm2, %v915_v36 }
 0x318   : > { %1892 = shalt.err (!%p1889_p0)
}
 0x319   : > { %s1893_s24 = scalar_lea.hbm %s2355_s6, 512  ;;  %s1897_s9 = scalar_lea.hbm %s2495_s8, 1024 }
 0x31a   : > { %p1894_p10 = scmp.ne.s32.totalorder %s2355_s6, %s1893_s24  ;;  %p1898_p12 = scmp.lt.s32.totalorder %s2355_s6, %s2495_s8 }
 0x31b   : > { %p1899_p13 = scmp.lt.s32.totalorder %s1897_s9, %s1893_s24 }
 0x31c   : > { %p1895_p9 = pnand %p1894_p10, %p2111_p8 }
 0x31d   : > { %p1900_p4 = por %p1899_p13, %p1898_p12 }
 0x31e   : > { %p1896_p3 = pneg %p1895_p9 }
 0x320   : > { %p1901_p7 = pnand %p1900_p4, %p1896_p3 }
 0x322   : > { %1904 = shalt.err (!%p1901_p7)
}
 0x323   : > { %s2016_s13 = smov 128   ;;  %s2017_s23 = smov 8  }
 0x324   : > { %1605 = dma.vmem_to_hbm [thread:$0]  (%p2111_p8), %s2357_s7, 512, %s2355_s6, %s1226_s18, %s2016_s13, %s2016_s13, %s2017_s23  }
 0x325   : > { %s498_s10 = scalar_lea.vmem [#allocation13], %s2247_s20  ;;  %s2496_s6 = sld [smem:[#allocation29_spill]] }
 0x326   : > { %s1242_s0 = sshll.u32 %s498_s10, 4  ;;  %s1221_s14 = scalar_lea.sflag [#allocation4], %s2244_s12  ;;  %s2389_s0 = int_to_ptr.vmem [resolvable:$true] %s1242_s0 }
 0x327   : > { %s1905_s17 = scalar_lea.vmem %s2389_s0, 512  ;;  %s2018_s3 = smov [#allocation13]  }
 0x328   : > { %p1906_p2 = scmp.ne.s32.totalorder %s2389_s0, %s1905_s17  ;;  %s1909_s24 = sshll.u32 %s2018_s3, 4  ;;  %s1910_s24 = int_to_ptr.vmem [resolvable:$false] %s1909_s24 }
 0x329   : > { %s1911_s15 = scalar_lea.vmem %s1910_s24, 1024  ;;  %p1912_p11 = scmp.lt.s32.totalorder %s2389_s0, %s1910_s24 }
 0x32a   : > { %p1907_p6 = pnand %p1906_p2, %p2111_p8  ;;  %p1913_p1 = scmp.lt.s32.totalorder %s1911_s15, %s1905_s17 }
 0x32b   : > { %s2396_s18 = scalar_lea.hbm %s2496_s6, %s1530_s1 }
 0x32c   : > { %p1908_p5 = pneg %p1907_p6  ;;  %p1914_p0 = por %p1913_p1, %p1912_p11 }
 0x32e   : > { %p1915_p10 = pnand %p1914_p0, %p1908_p5 }
 0x3c7   : > { %v989_v0 = vpop.f32.mrf.mxu0 }
 0x3c8   : > { %1212 = vst.msk [vmem:[%s498_s10] sm:$0xff] %vm567_vm2, %v989_v0 }
 0x3c9   : > { %v1572_v37 = vpop.f32.mrf.mxu0 }
 0x3cb   : > { %v1062_v38 = vpop.f32.mrf.mxu1 }
 0x3cc   : > { %1213 = vst.msk [vmem:[%s498_s10 + $0x8] sm:$0xff] %vm567_vm2, %v1062_v38 }
 0x3cd   : > { %v1577_v39 = vpop.f32.mrf.mxu1 }
 0x3d3   : > { %v1135_v40 = vpop.f32.mrf.mxu0 }
 0x3d4   : > { %1214 = vst.msk [vmem:[%s498_s10 + $0x10] sm:$0xff] %vm567_vm2, %v1135_v40 }
 0x3d5   : > { %v1582_v41 = vpop.f32.mrf.mxu0 }
 0x3d7   : > { %v1208_v42 = vpop.f32.mrf.mxu1 }
 0x3d8   : > { %1215 = vst.msk [vmem:[%s498_s10 + $0x18] sm:$0xff] %vm567_vm2, %v1208_v42 }
 0x3d9   : > { %v1587_v43 = vpop.f32.mrf.mxu1 }
 0x3da   : > { %1918 = shalt.err (!%p1915_p10)
}
 0x3db   : > { %s1919_s16 = scalar_lea.hbm %s2396_s18, 512  ;;  %s1923_s21 = scalar_lea.hbm %s2496_s6, 1024 }
 0x3dc   : > { %p1920_p9 = scmp.ne.s32.totalorder %s2396_s18, %s1919_s16  ;;  %p1924_p13 = scmp.lt.s32.totalorder %s2396_s18, %s2496_s6 }
 0x3dd   : > { %p1925_p4 = scmp.lt.s32.totalorder %s1923_s21, %s1919_s16 }
 0x3de   : > { %p1921_p3 = pnand %p1920_p9, %p2111_p8 }
 0x3df   : > { %p1926_p7 = por %p1925_p4, %p1924_p13 }
 0x3e0   : > { %p1922_p12 = pneg %p1921_p3 }
 0x3e2   : > { %p1927_p2 = pnand %p1926_p7, %p1922_p12 }
 0x3e4   : > { %1930 = shalt.err (!%p1927_p2)
}
 0x3e5   : > { %1604 = dma.vmem_to_hbm [thread:$0]  (%p2111_p8), %s2389_s0, 512, %s2396_s18, %s1221_s14, %s2016_s13, %s2016_s13, %s2017_s23  }
 0x3e6 PF: > { %s2497_s11 = sld [smem:[#allocation22_spill]]  ;;  %p2500_p5 = scmp.ge.s32.totalorder %s2001_s29, 2 }
 0x3e7   : > { %s2498_s10 = sld [smem:[#allocation25_spill]] }
 0x3ec   : > { %s1276_s20 = sand.u32 1, %s2497_s11  }
 0x3ed   : > { %p2499_p6 = scmp.ne.s32.totalorder %s2498_s10, 0  ;;  %s1277_s7 = scalar_lea.sflag [#allocation4], %s1276_s20 }
 0x3ef   : > { %p1629_p11 = pnand %p2500_p5, %p2499_p6 }
 0x3f1   : > { %p1630_p1 = pneg %p1629_p11 }
 0x3f3   : > { %1972 = dma.done.wait (%p1630_p1), %s1277_s7, 512  }
 0x3f4   : > { %1974 = vsyncadd (%p1630_p1), %s1277_s7, 4294966784  ;;  %s1286_s17 = scalar_lea.sflag [#allocation15], %s1276_s20 }
 0x3f5   : > { %1976 = dma.done.wait (%p1630_p1), %s1286_s17, 512  }
 0x3f6   : > { %1978 = vsyncadd (%p1630_p1), %s1286_s17, 4294966784  ;;  %s34_s29 = sadd.s32 1, %s2001_s29   ;;  %s2501_s24 = smov %s1985_s25 }
 0x3f7   : > { %p31_p0 = scmp.ge.s32.totalorder %s34_s29, 4   ;;  %s2502_s25 = smov %s1989_s26 }
 0x3f8   : > { %s2503_s26 = smov %s2169_s22  ;;  %s2504_s27 = smov %s1997_s28 }
 0x3f9   : > { %s2505_s28 = smov %s2507_s19  ;;  %33 = sbr.rel (!%p31_p0) target bundleno = 19 (0x13), region = 153 }
 0x3fe   :  { %1291 = vsyncpa [#allocation3], 1 }
 0x3ff   :  { %1293 = vsyncpa [#allocation3 + $0x1], 1 }
 0x400   :  { %1294 = vsyncpa [#allocation6], 1 }
 0x401   :  { %1296 = vsyncpa [#allocation6 + $0x1], 1 }
 0x402   :  { %1297 = vsyncpa [#allocation9], 1 }
 0x403   :  { %1298 = vsyncpa [#allocation12], 1 }
 0x404   :  { %1300 = vsyncpa [#allocation12 + $0x1], 1 }
 0x405   :  { %1301 = vsyncpa [#allocation4], 1 }
 0x406   :  { %1303 = vsyncpa [#allocation4 + $0x1], 1 }
 0x407   :  { %1304 = vsyncpa [#allocation15], 1 }
 0x408   :  { %1306 = vsyncpa [#allocation15 + $0x1], 1 }

</bundles_post_ra>
